<compile_context>
chip_gen: v7x
topology: tpu7x:2x2x1
jax: 0.10.0
libtpu: 0.0.40
codegen_flags: <defaults>
</compile_context>

<pallas_src>
import numpy as np
import jax
import jax.numpy as jnp
from jax.experimental import pallas as pl
from jax.experimental.pallas import tpu as pltpu

SCORE_THRESH = 0.7
_MAX_TILE = 32768                 # int8 lanes per mask block (multiple of 512)
_TARGET_BLOCK_BYTES = 2 << 20     # ~2 MiB of int8 per mask block (review: 1-4 MiB)


def _choose_tiling(Q, HW):
    """Pick (tile, chunk): tile = lanes per grid block, chunk = lanes per inner step."""
    if HW >= 512:
        chunk = 512
    elif HW >= 128:
        chunk = 128
    else:
        # Tiny masks: one full-width block (block last dim == full array dim is legal).
        return HW, HW
    # Largest multiple of `chunk` that (a) does not exceed HW (so block dims never exceed
    # array dims; remainder is handled by a standard cdiv boundary block), (b) keeps one
    # int8 mask block around _TARGET_BLOCK_BYTES, (c) stays under the hard cap.
    budget = max(chunk, (_TARGET_BLOCK_BYTES // max(Q, 1)) // chunk * chunk)
    tile = min(_MAX_TILE, budget, (HW // chunk) * chunk)
    return tile, chunk


def _make_kernel(tile, chunk):
    n_chunks = tile // chunk

    def kernel(scores_ref, boxes_ref, masks_ref, union_ref, boxes_out_ref, keep_ref):
        # scores_ref: (1, Q, 1) f32   boxes_ref: (1, Q, 4) f32   masks_ref: (1, Q, tile) i8
        # union_ref: (1, 1, tile) i8  boxes_out_ref: (1, Q, 4) f32  keep_ref: (1, Q, 1) i32
        keep = scores_ref[0] > SCORE_THRESH            # (Q, 1) bool, hoisted out of loop

        # OR over kept queries, one lane chunk at a time: the widened int32 intermediate
        # stays a few vregs (no f32 path, no whole-block materialization / spills).
        for c in range(n_chunks):
            off = c * chunk
            m = masks_ref[0, :, pl.ds(off, chunk)].astype(jnp.int32)   # (Q, chunk)
            masked = jnp.where(keep, m, 0)                             # int32 select
            u = jnp.max(masked, axis=0, keepdims=True) > 0             # (1, chunk)
            union_ref[0, :, pl.ds(off, chunk)] = u.astype(jnp.int8)

        # Per-image box/keep work is tiny (B*Q*4 floats); fold it into this kernel and run
        # it only on the first lane tile (output blocks are t-independent -> "arbitrary").
        @pl.when(pl.program_id(1) == 0)
        def _():
            keep_ref[...] = (scores_ref[...] > SCORE_THRESH).astype(jnp.int32)
            b = boxes_ref[...]
            xy = b[..., 0:2]
            wh = b[..., 2:4] - xy
            boxes_out_ref[...] = jnp.concatenate([xy, wh], axis=-1)

    return kernel


@jax.jit
def _phrasecut_batched(scores, boxes, masks):
    """scores (B,Q) ; boxes (B,Q,4) xyxy ; masks (B,Q,1,H,W) bool/int."""
    B, Q = scores.shape
    H, W = masks.shape[-2], masks.shape[-1]
    HW = H * W

    tile, chunk = _choose_tiling(Q, HW)
    num_tiles = -(-HW // tile)

    scores_f = scores.astype(jnp.float32).reshape(B, Q, 1)
    boxes_f = boxes.astype(jnp.float32)
    masks_i8 = masks.reshape(B, Q, HW)
    if masks_i8.dtype != jnp.int8:
        # One HBM pass; removed entirely if the producer already emits int8/uint8 masks.
        masks_i8 = masks_i8.astype(jnp.int8)

    # Explicit VMEM budget: 2 double-buffered int8 mask blocks + union blocks +
    # chunk-sized int32 intermediates, with headroom (safe on v5e 16 MiB scoped default
    # and v7x 64 MiB physical).
    vmem_limit = int(min(48 << 20, max(16 << 20, 6 * Q * tile + (8 << 20))))

    kernel = _make_kernel(tile, chunk)
    union_i8, boxes_xywh, keep_i32 = pl.pallas_call(
        kernel,
        out_shape=(jax.ShapeDtypeStruct((B, 1, HW), jnp.int8),
                   jax.ShapeDtypeStruct((B, Q, 4), jnp.float32),
                   jax.ShapeDtypeStruct((B, Q, 1), jnp.int32)),
        grid=(B, num_tiles),
        in_specs=[pl.BlockSpec((1, Q, 1), lambda b, t: (b, 0, 0)),      # scores
                  pl.BlockSpec((1, Q, 4), lambda b, t: (b, 0, 0)),      # boxes (xyxy)
                  pl.BlockSpec((1, Q, tile), lambda b, t: (b, 0, t))],  # masks (int8)
        out_specs=(pl.BlockSpec((1, 1, tile), lambda b, t: (b, 0, t)),  # union (int8)
                   pl.BlockSpec((1, Q, 4), lambda b, t: (b, 0, 0)),     # boxes (xywh)
                   pl.BlockSpec((1, Q, 1), lambda b, t: (b, 0, 0))),    # keep
        compiler_params=pltpu.CompilerParams(
            # Batch axis parallel (v7x megacore splits images); tile axis arbitrary since
            # the box/keep output blocks are resident across it.  (If B == 1, the union
            # could instead expose a parallel lane axis — not needed for typical batches.)
            dimension_semantics=("parallel", "arbitrary"),
            vmem_limit_bytes=vmem_limit),
    )(scores_f, boxes_f, masks_i8)

    union = union_i8[:, 0, :].reshape(B, H, W)
    return boxes_xywh, keep_i32[:, :, 0], union


def phrasecut_postprocess(results):
    """Mimics PostProcessPhrasecut.forward on a list of per-image dicts (masks required)."""
    scores = jnp.stack([jnp.asarray(e["scores"]) for e in results])
    boxes = jnp.stack([jnp.asarray(e["boxes"]) for e in results])
    masks = jnp.stack([jnp.asarray(e["masks"]) for e in results])

    boxes_xywh, keep_i32, union = _phrasecut_batched(scores, boxes, masks)
    jax.block_until_ready((boxes_xywh, keep_i32, union))   # single host sync per batch

    boxes_np = np.asarray(boxes_xywh)
    keep_np = np.asarray(keep_i32).astype(bool)
    union_np = np.asarray(union).astype(bool)

    final_results = []
    for b in range(len(results)):
        # Dynamic-shape row filter (no fixed-shape TPU equivalent) stays on the host.
        kept_boxes = boxes_np[b][keep_np[b]].reshape(-1, 4)
        final_results.append({"boxes": kept_boxes.tolist(), "masks": union_np[b]})
    return final_results


def _reference_numpy(results):
    out = []
    for elem in results:
        scores = np.asarray(elem["scores"])
        boxes = np.asarray(elem["boxes"]).copy()
        masks = np.asarray(elem["masks"])
        keep = scores > SCORE_THRESH
        b = boxes[keep].reshape(-1, 4)
        b[..., 2:] -= b[..., :2]
        union = masks[keep].any(0).squeeze(0) if keep.any() else np.zeros(
            masks.shape[-2:], dtype=bool)
        out.append({"boxes": b.tolist(), "masks": union})
    return out


if __name__ == "__main__":
    key = jax.random.PRNGKey(0)
    # H=W=20 -> HW=400: exercises the multi-tile grid (tile=384), the cdiv boundary block,
    # and the in-kernel lane-chunk loop.
    B, Q, H, W = 2, 8, 20, 20

    k1, k2, k3 = jax.random.split(key, 3)
    scores_all = jax.random.uniform(k1, (B, Q), dtype=jnp.float32)
    # boxes as valid xyxy in [0, 1): x2 >= x1, y2 >= y1
    xy = jax.random.uniform(k2, (B, Q, 2), dtype=jnp.float32) * 0.5
    wh = jax.random.uniform(k3, (B, Q, 2), dtype=jnp.float32) * 0.4 + 0.05
    boxes_all = jnp.concatenate([xy, xy + wh], axis=-1)
    masks_all = (jax.random.uniform(jax.random.PRNGKey(1), (B, Q, 1, H, W)) > 0.5)

    results = [
        {"scores": scores_all[b], "boxes": boxes_all[b], "masks": masks_all[b]}
        for b in range(B)
    ]

    kernel_out = phrasecut_postprocess(results)
    ref_out = _reference_numpy(results)

    for ko, ro in zip(kernel_out, ref_out):
        np.testing.assert_allclose(
            np.asarray(ko["boxes"], dtype=np.float32).reshape(-1, 4),
            np.asarray(ro["boxes"], dtype=np.float32).reshape(-1, 4),
            rtol=1e-6, atol=1e-6)
        np.testing.assert_array_equal(ko["masks"], ro["masks"])

    print("KERNEL_OK")
</pallas_src>

<mosaic_0001>
module attributes {stable_mosaic.version = 11 : i64} {
  func.func @kernel(%arg0: i32, %arg1: i32, %arg2: memref<1x8x1xf32, #tpu.memory_space<vmem>>, %arg3: memref<1x8x4xf32, #tpu.memory_space<vmem>>, %arg4: memref<1x8x384xi8, #tpu.memory_space<vmem>>, %arg5: memref<1x1x384xi8, #tpu.memory_space<vmem>>, %arg6: memref<1x8x4xf32, #tpu.memory_space<vmem>>, %arg7: memref<1x8x1xi32, #tpu.memory_space<vmem>>) attributes {dimension_semantics = [#tpu.dimension_semantics<parallel>, #tpu.dimension_semantics<arbitrary>], iteration_bounds = array<i64: 2, 2>, scalar_prefetch = 0 : i64, scratch_operands = 0 : i64, tpu.core_type = #tpu.core_type<tc>, window_params = [{transform_indices = @transform_0, window_bounds = array<i64: 1, 8, 1>}, {transform_indices = @transform_1, window_bounds = array<i64: 1, 8, 4>}, {transform_indices = @transform_2, window_bounds = array<i64: 1, 8, 384>}, {transform_indices = @transform_3, window_bounds = array<i64: 1, 1, 384>}, {transform_indices = @transform_4, window_bounds = array<i64: 1, 8, 4>}, {transform_indices = @transform_5, window_bounds = array<i64: 1, 8, 1>}]} {
    %c0 = arith.constant 0 : index
    %c0_0 = arith.constant 0 : index
    %c0_1 = arith.constant 0 : index
    %0 = vector.load %arg2[%c0, %c0_0, %c0_1] : memref<1x8x1xf32, #tpu.memory_space<vmem>>, vector<1x8x1xf32>
    %1 = vector.shape_cast %0 : vector<1x8x1xf32> to vector<8x1xf32>
    %cst = arith.constant 0.699999988 : f32
    %2 = vector.broadcast %cst : f32 to vector<8x1xf32>
    %3 = arith.cmpf ogt, %1, %2 : vector<8x1xf32>
    %c0_2 = arith.constant 0 : index
    %c0_3 = arith.constant 0 : index
    %c0_4 = arith.constant 0 : index
    %4 = vector.load %arg4[%c0_2, %c0_3, %c0_4] : memref<1x8x384xi8, #tpu.memory_space<vmem>>, vector<1x8x128xi8>
    %5 = vector.shape_cast %4 : vector<1x8x128xi8> to vector<8x128xi8>
    %6 = arith.extsi %5 : vector<8x128xi8> to vector<8x128xi32>
    %c0_i32 = arith.constant 0 : i32
    %7 = vector.shape_cast %3 : vector<8x1xi1> to vector<8x1xi1>
    %8 = vector.broadcast %7 : vector<8x1xi1> to vector<8x128xi1>
    %9 = vector.broadcast %c0_i32 : i32 to vector<8x128xi32>
    %10 = arith.select %8, %6, %9 : vector<8x128xi1>, vector<8x128xi32>
    %cst_5 = arith.constant dense<-2147483648> : vector<128xi32>
    %11 = vector.multi_reduction <maxsi>, %10, %cst_5 [0] : vector<8x128xi32> to vector<128xi32>
    %12 = vector.shape_cast %11 : vector<128xi32> to vector<1x128xi32>
    %c0_i32_6 = arith.constant 0 : i32
    %13 = vector.broadcast %c0_i32_6 : i32 to vector<1x128xi32>
    %14 = arith.cmpi sgt, %12, %13 : vector<1x128xi32>
    %15 = arith.extui %14 : vector<1x128xi1> to vector<1x128xi8>
    %c0_7 = arith.constant 0 : index
    %c0_8 = arith.constant 0 : index
    %c0_9 = arith.constant 0 : index
    %16 = vector.load %arg5[%c0_7, %c0_8, %c0_9] : memref<1x1x384xi8, #tpu.memory_space<vmem>>, vector<1x1x128xi8>
    %17 = vector.shape_cast %16 : vector<1x1x128xi8> to vector<1x128xi8>
    %18 = vector.shape_cast %15 : vector<1x128xi8> to vector<1x1x128xi8>
    tpu.vector_store %arg5[%c0_7, %c0_8, %c0_9], %18 {strides = array<i32>} : memref<1x1x384xi8, #tpu.memory_space<vmem>>, vector<1x1x128xi8>,
    %c0_10 = arith.constant 0 : index
    %c0_11 = arith.constant 0 : index
    %c128 = arith.constant 128 : index
    %19 = vector.load %arg4[%c0_10, %c0_11, %c128] : memref<1x8x384xi8, #tpu.memory_space<vmem>>, vector<1x8x128xi8>
    %20 = vector.shape_cast %19 : vector<1x8x128xi8> to vector<8x128xi8>
    %21 = arith.extsi %20 : vector<8x128xi8> to vector<8x128xi32>
    %c0_i32_12 = arith.constant 0 : i32
    %22 = vector.shape_cast %3 : vector<8x1xi1> to vector<8x1xi1>
    %23 = vector.broadcast %22 : vector<8x1xi1> to vector<8x128xi1>
    %24 = vector.broadcast %c0_i32_12 : i32 to vector<8x128xi32>
    %25 = arith.select %23, %21, %24 : vector<8x128xi1>, vector<8x128xi32>
    %cst_13 = arith.constant dense<-2147483648> : vector<128xi32>
    %26 = vector.multi_reduction <maxsi>, %25, %cst_13 [0] : vector<8x128xi32> to vector<128xi32>
    %27 = vector.shape_cast %26 : vector<128xi32> to vector<1x128xi32>
    %c0_i32_14 = arith.constant 0 : i32
    %28 = vector.broadcast %c0_i32_14 : i32 to vector<1x128xi32>
    %29 = arith.cmpi sgt, %27, %28 : vector<1x128xi32>
    %30 = arith.extui %29 : vector<1x128xi1> to vector<1x128xi8>
    %c0_15 = arith.constant 0 : index
    %c0_16 = arith.constant 0 : index
    %c128_17 = arith.constant 128 : index
    %31 = vector.load %arg5[%c0_15, %c0_16, %c128_17] : memref<1x1x384xi8, #tpu.memory_space<vmem>>, vector<1x1x128xi8>
    %32 = vector.shape_cast %31 : vector<1x1x128xi8> to vector<1x128xi8>
    %33 = vector.shape_cast %30 : vector<1x128xi8> to vector<1x1x128xi8>
    tpu.vector_store %arg5[%c0_15, %c0_16, %c128_17], %33 {strides = array<i32>} : memref<1x1x384xi8, #tpu.memory_space<vmem>>, vector<1x1x128xi8>,
    %c0_18 = arith.constant 0 : index
    %c0_19 = arith.constant 0 : index
    %c256 = arith.constant 256 : index
    %34 = vector.load %arg4[%c0_18, %c0_19, %c256] : memref<1x8x384xi8, #tpu.memory_space<vmem>>, vector<1x8x128xi8>
    %35 = vector.shape_cast %34 : vector<1x8x128xi8> to vector<8x128xi8>
    %36 = arith.extsi %35 : vector<8x128xi8> to vector<8x128xi32>
    %c0_i32_20 = arith.constant 0 : i32
    %37 = vector.shape_cast %3 : vector<8x1xi1> to vector<8x1xi1>
    %38 = vector.broadcast %37 : vector<8x1xi1> to vector<8x128xi1>
    %39 = vector.broadcast %c0_i32_20 : i32 to vector<8x128xi32>
    %40 = arith.select %38, %36, %39 : vector<8x128xi1>, vector<8x128xi32>
    %cst_21 = arith.constant dense<-2147483648> : vector<128xi32>
    %41 = vector.multi_reduction <maxsi>, %40, %cst_21 [0] : vector<8x128xi32> to vector<128xi32>
    %42 = vector.shape_cast %41 : vector<128xi32> to vector<1x128xi32>
    %c0_i32_22 = arith.constant 0 : i32
    %43 = vector.broadcast %c0_i32_22 : i32 to vector<1x128xi32>
    %44 = arith.cmpi sgt, %42, %43 : vector<1x128xi32>
    %45 = arith.extui %44 : vector<1x128xi1> to vector<1x128xi8>
    %c0_23 = arith.constant 0 : index
    %c0_24 = arith.constant 0 : index
    %c256_25 = arith.constant 256 : index
    %46 = vector.load %arg5[%c0_23, %c0_24, %c256_25] : memref<1x1x384xi8, #tpu.memory_space<vmem>>, vector<1x1x128xi8>
    %47 = vector.shape_cast %46 : vector<1x1x128xi8> to vector<1x128xi8>
    %48 = vector.shape_cast %45 : vector<1x128xi8> to vector<1x1x128xi8>
    tpu.vector_store %arg5[%c0_23, %c0_24, %c256_25], %48 {strides = array<i32>} : memref<1x1x384xi8, #tpu.memory_space<vmem>>, vector<1x1x128xi8>,
    %c0_i32_26 = arith.constant 0 : i32
    %49 = arith.cmpi eq, %arg1, %c0_i32_26 : i32
    %50 = arith.extui %49 : i1 to i32
    %c0_i32_27 = arith.constant 0 : i32
    %51 = arith.cmpi ne, %50, %c0_i32_27 : i32
    scf.if %51 {
      %c0_28 = arith.constant 0 : index
      %c0_29 = arith.constant 0 : index
      %c0_30 = arith.constant 0 : index
      %52 = vector.load %arg2[%c0_28, %c0_29, %c0_30] : memref<1x8x1xf32, #tpu.memory_space<vmem>>, vector<1x8x1xf32>
      %cst_31 = arith.constant 0.699999988 : f32
      %53 = vector.broadcast %cst_31 : f32 to vector<1x8x1xf32>
      %54 = arith.cmpf ogt, %52, %53 : vector<1x8x1xf32>
      %55 = arith.extui %54 : vector<1x8x1xi1> to vector<1x8x1xi32>
      %c0_32 = arith.constant 0 : index
      %c0_33 = arith.constant 0 : index
      %c0_34 = arith.constant 0 : index
      %56 = vector.load %arg7[%c0_32, %c0_33, %c0_34] : memref<1x8x1xi32, #tpu.memory_space<vmem>>, vector<1x8x1xi32>
      tpu.vector_store %arg7[%c0_32, %c0_33, %c0_34], %55 {strides = array<i32>} : memref<1x8x1xi32, #tpu.memory_space<vmem>>, vector<1x8x1xi32>,
      %c0_35 = arith.constant 0 : index
      %c0_36 = arith.constant 0 : index
      %c0_37 = arith.constant 0 : index
      %57 = vector.load %arg3[%c0_35, %c0_36, %c0_37] : memref<1x8x4xf32, #tpu.memory_space<vmem>>, vector<1x8x4xf32>
      %58 = vector.extract_strided_slice %57 {offsets = [0, 0, 0], sizes = [1, 8, 2], strides = [1, 1, 1]} : vector<1x8x4xf32> to vector<1x8x2xf32>
      %59 = vector.extract_strided_slice %57 {offsets = [0, 0, 2], sizes = [1, 8, 2], strides = [1, 1, 1]} : vector<1x8x4xf32> to vector<1x8x2xf32>
      %60 = arith.subf %59, %58 : vector<1x8x2xf32>
      %61 = tpu.concatenate %58, %60 in 2 : vector<1x8x2xf32>, vector<1x8x2xf32> -> vector<1x8x4xf32>
      %c0_38 = arith.constant 0 : index
      %c0_39 = arith.constant 0 : index
      %c0_40 = arith.constant 0 : index
      %62 = vector.load %arg6[%c0_38, %c0_39, %c0_40] : memref<1x8x4xf32, #tpu.memory_space<vmem>>, vector<1x8x4xf32>
      tpu.vector_store %arg6[%c0_38, %c0_39, %c0_40], %61 {strides = array<i32>} : memref<1x8x4xf32, #tpu.memory_space<vmem>>, vector<1x8x4xf32>,
    } else {
    }
    return
  }
  func.func @transform_0(%arg0: i32, %arg1: i32) -> (i32, i32, i32) {
    %c0_i32 = arith.constant 0 : i32
    %c0_i32_0 = arith.constant 0 : i32
    %c0_i32_1 = arith.constant 0 : i32
    return %arg0, %c0_i32, %c0_i32_0 : i32, i32, i32
  }
  func.func @transform_1(%arg0: i32, %arg1: i32) -> (i32, i32, i32) {
    %c0_i32 = arith.constant 0 : i32
    %c0_i32_0 = arith.constant 0 : i32
    %c0_i32_1 = arith.constant 0 : i32
    return %arg0, %c0_i32, %c0_i32_0 : i32, i32, i32
  }
  func.func @transform_2(%arg0: i32, %arg1: i32) -> (i32, i32, i32) {
    %c0_i32 = arith.constant 0 : i32
    %c0_i32_0 = arith.constant 0 : i32
    return %arg0, %c0_i32, %arg1 : i32, i32, i32
  }
  func.func @transform_3(%arg0: i32, %arg1: i32) -> (i32, i32, i32) {
    %c0_i32 = arith.constant 0 : i32
    %c0_i32_0 = arith.constant 0 : i32
    return %arg0, %c0_i32, %arg1 : i32, i32, i32
  }
  func.func @transform_4(%arg0: i32, %arg1: i32) -> (i32, i32, i32) {
    %c0_i32 = arith.constant 0 : i32
    %c0_i32_0 = arith.constant 0 : i32
    %c0_i32_1 = arith.constant 0 : i32
    return %arg0, %c0_i32, %c0_i32_0 : i32, i32, i32
  }
  func.func @transform_5(%arg0: i32, %arg1: i32) -> (i32, i32, i32) {
    %c0_i32 = arith.constant 0 : i32
    %c0_i32_0 = arith.constant 0 : i32
    %c0_i32_1 = arith.constant 0 : i32
    return %arg0, %c0_i32, %c0_i32_0 : i32, i32, i32
  }
}

</mosaic_0001>

<bundles_post_ra>
// kernel: squeeze.2
= control target key start
LH: loop header
LB: loop body
LE: loop exit
PB: predicated region body
PF: predicated region fallthrough
CT: control target
= control target key end

     0   :  { %s415_s0 = inlined_call_operand.vmem [shape: s8[2,400], index: 0, kind: input, shape index: {}]   ;;  %s416_s1 = inlined_call_operand.hbm [shape: s8[2,20,20], index: 1, kind: output, shape index: {}]  }
   0x1   :  { %v297_v0 = vld [vmem:[%s415_s0 + $0x1] sm:$0x1]  ;;  %v296_v1 = vld [vmem:[%s415_s0 + $0x2] sm:$0x1]  ;;  %v60_v4 = vld [vmem:[%s415_s0] sm:$0x1] }
   0x2   :  { %v47_v2 = vunpack.c.0.s8 %v297_v0  ;;  %v32_v3 = vunpack.c.0.s8 %v296_v1  ;;  %v61_v5 = vunpack.c.0.s8 %v60_v4  ;;  %v295_v6 = vld [vmem:[%s415_s0 + $0x3] sm:$0x1] }
   0x3   :  { %v16_v7 = vunpack.c.0.s8 %v295_v6 }
   0x4   :  { %52 = vst [vmem:[#allocation3 + $0x8] sm:$0xf] %v47_v2  ;;  %37 = vst [vmem:[#allocation3 + $0x10] sm:$0xf] %v32_v3 }
   0x5   :  { %2 = vsyncpa [#allocation1], 0  ;;  %65 = vst [vmem:[#allocation3] sm:$0xf] %v61_v5  ;;  %s70_s0 = smov 3  ;;  %s91_s14 = smov 3 }
   0x6   :  { %21 = vst [vmem:[#allocation3 + $0x18] sm:$0xf] %v16_v7  ;;  %s187_s15 = smov 3  ;;  %s190_s16 = smov 3  ;;  %vm192_vm0 = vcmask 916480   ;;  %vm205_vm1 = vcmask 982016  }
   0x7   :  { %s343_s17 = smov 116   ;;  %s344_s18 = smov 124   ;;  %vm221_vm2 = vcmask 1014784   ;;  %vm67_vm3 = vcmask 162816   ;;  %vm196_vm4 = vcmask 130048   ;;  %vm199_vm5 = vcmask 162944  }
   0x8   :  { %s99_s19 = smov 3  ;;  %s216_s20 = smov 3  ;;  %vm209_vm6 = vcmask 64512   ;;  %vm225_vm7 = vcmask 31744   ;;  %vm212_vm8 = vcmask 162880   ;;  %vm228_vm9 = vcmask 162848  }
   0x9   :  { %s219_s21 = smov 3  ;;  %s345_s22 = smov 104   ;;  %v362_v56 = vmov 0  }
   0xa   :  { %s346_s23 = smov 108   ;;  %s347_s24 = smov 16  }
   0xb   :  { %v78_v8 = vld [vmem:[#allocation3 + $0x8] sm:$0x3]   ;;  %v71_v9 = vld [vmem:[#allocation3 + $0x11] ss:$-1 sm:%s70_s0]   ;;  %s348_s25 = smov 96   ;;  %s113_s26 = smov 3 }
   0xc   :  { %79 = vrot.lane.b32.xlu0 %v78_v8, %s343_s17  ;;  %72 = vrot.lane.b32.xlu1 %v71_v9, %s344_s18  ;;  %v92_v10 = vld [vmem:[#allocation3 + $0x11] ss:$-1 sm:%s91_s14]   ;;  %v84_v11 = vld [vmem:[#allocation3] sm:$0x3]   ;;  %v188_v12 = vld [vmem:[#allocation3 + $0x9] ss:$-1 sm:%s187_s15]  }
   0xd   :  { %v191_v13 = vld [vmem:[#allocation3 + $0x11] ss:$-1 sm:%s190_s16]   ;;  %v100_v15 = vld [vmem:[#allocation3 + $0x9] ss:$-1 sm:%s99_s19]   ;;  %v202_v16 = vld [vmem:[#allocation3] sm:$0x3]  }
   0xe   :  { %v193_v14 = vsel %vm192_vm0, %v191_v13, %v188_v12  ;;  %v204_v17 = vld [vmem:[#allocation3 + $0x8] sm:$0x3]   ;;  %v217_v18 = vld [vmem:[#allocation3 + $0x11] ss:$-1 sm:%s216_s20]   ;;  %v220_v19 = vld [vmem:[#allocation3 + $0x19] ss:$-1 sm:%s219_s21]  }
   0xf   :  { %v206_v20 = vsel %vm205_vm1, %v204_v17, %v202_v16  ;;  %v222_v21 = vsel %vm221_vm2, %v220_v19, %v217_v18  ;;  %s349_s27 = smov 8   ;;  %s350_s28 = smov 4   ;;  %v106_v22 = vld [vmem:[#allocation3] sm:$0x3]   ;;  %v114_v23 = vld [vmem:[#allocation3 + $0x11] ss:$-1 sm:%s113_s26]  }
  0x10   :  { %93 = vrot.lane.b32.xlu0 %v92_v10, %s345_s22  ;;  %85 = vrot.lane.b32.xlu1 %v84_v11, %s346_s23  ;;  %s121_s29 = smov 3  ;;  %s351_s30 = smov 88   ;;  %v128_v25 = vld [vmem:[#allocation3] sm:$0x3]  }
  0x11   :  { %s352_s2 = smov 84   ;;  %v122_v24 = vld [vmem:[#allocation3 + $0x9] ss:$-1 sm:%s121_s29]   ;;  %s135_s3 = smov 3  ;;  %v66_v26 = vld [vmem:[#allocation3] sm:$0x3]  }
  0x12   :  { %s143_s4 = smov 3  ;;  %68 = vst.msk [vmem:[#allocation2] ss:$24 sm:$0x3] %vm67_vm3, %v66_v26   ;;  %s353_s5 = smov 76  }
  0x13   :  { %s354_s6 = smov 68   ;;  %v136_v27 = vld [vmem:[#allocation3 + $0x11] ss:$-1 sm:%s135_s3]   ;;  %v144_v28 = vld [vmem:[#allocation3 + $0x9] ss:$-1 sm:%s143_s4]   ;;  %s157_s7 = smov 3 }
  0x14   :  { %194 = vrot.lane.b32.xlu0 %v193_v14, %s347_s24  ;;  %101 = vrot.lane.b32.xlu1 %v100_v15, %s348_s25  ;;  %s355_s8 = smov 64   ;;  %s356_s9 = smov 56   ;;  %v150_v29 = vld [vmem:[#allocation3] sm:$0x3]   ;;  %v158_v30 = vld [vmem:[#allocation3 + $0x11] ss:$-1 sm:%s157_s7]  }
  0x15   :  { %s165_s10 = smov 3  ;;  %s357_s11 = smov 48   ;;  %v172_v32 = vld [vmem:[#allocation3] sm:$0x3]  }
  0x16   :  { %s358_s12 = smov 44   ;;  %v166_v31 = vld [vmem:[#allocation3 + $0x9] ss:$-1 sm:%s165_s10]   ;;  %s179_s13 = smov 3 }
  0x17   :  { %s359_s0 = smov 36   ;;  %s360_s14 = smov 28   ;;  %v180_v33 = vld [vmem:[#allocation3 + $0x11] ss:$-1 sm:%s179_s13]  }
  0x18   :  { %207 = vrot.lane.b32.xlu0 %v206_v20, %s349_s27  ;;  %223 = vrot.lane.b32.xlu1 %v222_v21, %s350_s28  ;;  %s361_s15 = smov 24   ;;  %s363_s16 = smov [#allocation0]  }
  0x19   :  { %s283_s17 = sshll.u32 %s363_s16, 4  ;;  %s284_s17 = int_to_ptr.vmem [resolvable:$true] %s283_s17 }
  0x1a   :  { %s319_s18 = scalar_lea.vmem %s284_s17, 192  ;;  %p324_p1 = scmp.lt.s32.totalorder %s284_s17, %s284_s17 }
  0x1b   :  { %p320_p0 = scmp.ne.s32.totalorder %s284_s17, %s319_s18  ;;  %p325_p2 = scmp.lt.s32.totalorder %s319_s18, %s319_s18 }
  0x1c   :  { %107 = vrot.lane.b32.xlu0 %v106_v22, %s351_s30  ;;  %115 = vrot.lane.b32.xlu1 %v114_v23, %s352_s2 }
  0x1d   :  { %p326_p3 = por %p325_p2, %p324_p1 }
  0x1f   :  { %p327_p4 = pnand %p326_p3, %p320_p0 }
  0x20   :  { %123 = vrot.lane.b32.xlu0 %v122_v24, %s353_s5  ;;  %129 = vrot.lane.b32.xlu1 %v128_v25, %s354_s6 }
  0x24   :  { %137 = vrot.lane.b32.xlu0 %v136_v27, %s355_s8  ;;  %145 = vrot.lane.b32.xlu1 %v144_v28, %s356_s9 }
  0x28   :  { %151 = vrot.lane.b32.xlu0 %v150_v29, %s357_s11  ;;  %159 = vrot.lane.b32.xlu1 %v158_v30, %s358_s12 }
  0x2c   :  { %167 = vrot.lane.b32.xlu0 %v166_v31, %s359_s0  ;;  %173 = vrot.lane.b32.xlu1 %v172_v32, %s360_s14 }
  0x30   :  { %181 = vrot.lane.b32.xlu0 %v180_v33, %s361_s15 }
  0x7e   :  { %v80_v34 = vpop.permute.xlu0 %79   ;;  %v73_v35 = vpop.permute.xlu1 %72  }
  0x7f   :  { %83 = vst.msk [vmem:[#allocation2 + $0x7] ss:$24 sm:$0x3] %vm67_vm3, %v80_v34   ;;  %76 = vst.msk [vmem:[#allocation2 + $0x25] ss:$-24 sm:$0x3] %vm67_vm3, %v73_v35  }
  0x82   :  { %v94_v36 = vpop.permute.xlu0 %93   ;;  %v86_v37 = vpop.permute.xlu1 %85  }
  0x83   :  { %97 = vst.msk [vmem:[#allocation2 + $0x26] ss:$-24 sm:$0x3] %vm67_vm3, %v94_v36   ;;  %89 = vst.msk [vmem:[#allocation2 + $0x1] ss:$24 sm:$0x3] %vm67_vm3, %v86_v37  }
  0x86   :  { %v195_v38 = vpop.permute.xlu0 %194   ;;  %v102_v39 = vpop.permute.xlu1 %101  }
  0x87   :  { %198 = vst.msk [vmem:[#allocation2 + $0x24] ss:$-24 sm:$0x3] %vm196_vm4, %v195_v38  }
  0x88   :  { %105 = vst.msk [vmem:[#allocation2 + $0x20] ss:$-24 sm:$0x3] %vm67_vm3, %v102_v39  }
  0x89   :  { %201 = vst.msk [vmem:[#allocation2 + $0x24] ss:$-24 sm:$0x3] %vm199_vm5, %v195_v38  }
  0x8a   :  { %v208_v40 = vpop.permute.xlu0 %207   ;;  %v224_v41 = vpop.permute.xlu1 %223  }
  0x8b   :  { %211 = vst.msk [vmem:[#allocation2 + $0x6] ss:$24 sm:$0x3] %vm209_vm6, %v208_v40  }
  0x8c   :  { %227 = vst.msk [vmem:[#allocation2 + $0x2b] ss:$-24 sm:$0x3] %vm225_vm7, %v224_v41  }
  0x8d   :  { %214 = vst.msk [vmem:[#allocation2 + $0x6] ss:$24 sm:$0x3] %vm212_vm8, %v208_v40  }
  0x8e   :  { %230 = vst.msk [vmem:[#allocation2 + $0x2b] ss:$-24 sm:$0x3] %vm228_vm9, %v224_v41   ;;  %v108_v42 = vpop.permute.xlu0 %107   ;;  %v116_v43 = vpop.permute.xlu1 %115  }
  0x8f   :  { %111 = vst.msk [vmem:[#allocation2 + $0x2] ss:$24 sm:$0x3] %vm67_vm3, %v108_v42   ;;  %119 = vst.msk [vmem:[#allocation2 + $0x27] ss:$-24 sm:$0x3] %vm67_vm3, %v116_v43  }
  0x92   :  { %v124_v44 = vpop.permute.xlu0 %123   ;;  %v130_v45 = vpop.permute.xlu1 %129  }
  0x93   :  { %127 = vst.msk [vmem:[#allocation2 + $0x21] ss:$-24 sm:$0x3] %vm67_vm3, %v124_v44   ;;  %133 = vst.msk [vmem:[#allocation2 + $0x3] ss:$24 sm:$0x3] %vm67_vm3, %v130_v45  }
  0x96   :  { %v138_v46 = vpop.permute.xlu0 %137   ;;  %v146_v47 = vpop.permute.xlu1 %145  }
  0x97   :  { %141 = vst.msk [vmem:[#allocation2 + $0x28] ss:$-24 sm:$0x3] %vm67_vm3, %v138_v46   ;;  %149 = vst.msk [vmem:[#allocation2 + $0x22] ss:$-24 sm:$0x3] %vm67_vm3, %v146_v47  }
  0x9a   :  { %v152_v48 = vpop.permute.xlu0 %151   ;;  %v160_v49 = vpop.permute.xlu1 %159  }
  0x9b   :  { %155 = vst.msk [vmem:[#allocation2 + $0x4] ss:$24 sm:$0x3] %vm67_vm3, %v152_v48   ;;  %163 = vst.msk [vmem:[#allocation2 + $0x29] ss:$-24 sm:$0x3] %vm67_vm3, %v160_v49  }
  0x9e   :  { %v168_v50 = vpop.permute.xlu0 %167   ;;  %v174_v51 = vpop.permute.xlu1 %173  }
  0x9f   :  { %171 = vst.msk [vmem:[#allocation2 + $0x23] ss:$-24 sm:$0x3] %vm67_vm3, %v168_v50   ;;  %177 = vst.msk [vmem:[#allocation2 + $0x5] ss:$24 sm:$0x3] %vm67_vm3, %v174_v51  }
  0xa2   :  { %v182_v52 = vpop.permute.xlu0 %181  }
  0xa3   :  { %185 = vst.msk [vmem:[#allocation2 + $0x2a] ss:$-24 sm:$0x3] %vm67_vm3, %v182_v52  }
  0xa6   :  { %v235_v53 = vld [vmem:[#allocation2] sm:$0xff]  ;;  %v241_v54 = vld [vmem:[#allocation2 + $0x8] sm:$0xff]  ;;  %v256_v55 = vld [vmem:[#allocation2 + $0x18] sm:$0xff] }
  0xa7   :  { %v237_v57 = vpack.c.b16 %v362_v56, %v235_v53  ;;  %v244_v58 = vpack.c.b16 %v362_v56, %v241_v54  ;;  %v260_v59 = vpack.c.b16 %v362_v56, %v256_v55  ;;  %v264_v60 = vld [vmem:[#allocation2 + $0x20] sm:$0xff] }
  0xa8   :  { %v268_v61 = vpack.c.b16 %v362_v56, %v264_v60 }
  0xa9   :  { %v238_v62 = vpack.c.b8 %v362_v56, %v237_v57  ;;  %v245_v63 = vpack.c.b8 %v362_v56, %v244_v58  ;;  %v261_v0 = vpack.c.b8 %v362_v56, %v260_v59 }
  0xaa   :  { %v248_v1 = vld [vmem:[#allocation2 + $0x10] sm:$0xff]  ;;  %v269_v2 = vpack.c.b8 %v362_v56, %v268_v61  ;;  %v272_v3 = vld [vmem:[#allocation2 + $0x28] sm:$0xff] }
  0xab   :  { %239 = vst [vmem:[#allocation0] sm:$0x3] %v238_v62  ;;  %246 = vst [vmem:[#allocation0 + $0x2] sm:$0x3] %v245_v63  ;;  %v252_v4 = vpack.c.b16 %v362_v56, %v248_v1  ;;  %v276_v5 = vpack.c.b16 %v362_v56, %v272_v3 }
  0xac   :  { %262 = vst [vmem:[#allocation0 + $0x6] sm:$0x3] %v261_v0  ;;  %270 = vst [vmem:[#allocation0 + $0x8] sm:$0x3] %v269_v2 }
  0xad   :  { %v253_v6 = vpack.c.b8 %v362_v56, %v252_v4  ;;  %v277_v7 = vpack.c.b8 %v362_v56, %v276_v5 }
  0xaf   :  { %254 = vst [vmem:[#allocation0 + $0x4] sm:$0x3] %v253_v6  ;;  %278 = vst [vmem:[#allocation0 + $0xa] sm:$0x3] %v277_v7 }
  0xb0   :  { %330 = shalt.err (!%p327_p4)
}
  0xb1   :  { %s331_s21 = scalar_lea.hbm %s416_s1, 192 }
  0xb2   :  { %p332_p5 = scmp.ne.s32.totalorder %s416_s1, %s331_s21  ;;  %p335_p6 = scmp.lt.u32.totalorder %s331_s21, %s416_s1 }
  0xb4   :  { %p337_p7 = pnand %p335_p6, %p332_p5 }
  0xb6   :  { %340 = shalt.err (!%p337_p7)
}
  0xb7   :  { %286 = dma.vmem_to_hbm [thread:$0]  %s284_s17, 192, %s416_s1, [#allocation1]  }
  0xb8   :  { %341 = dma.done.wait [#allocation1], 192  }
  0xb9   :  { %342 = vsyncadd [#allocation1], 4294967104 }
  0xba   :  { %288 = vsyncpa [#allocation1], 1 }

// kernel: _phrasecut_batched.1
= control target key start
LH: loop header
LB: loop body
LE: loop exit
PB: predicated region body
PF: predicated region fallthrough
CT: control target
= control target key end

     0   :  { %s2094_s0 = inlined_call_operand.vmem [shape: f32[2,8,1], index: 0, kind: input, shape index: {}]   ;;  %s2095_s1 = inlined_call_operand.vmem [shape: f32[2,8,4], index: 1, kind: input, shape index: {}]   ;;  %s2096_s2 = inlined_call_operand.vmem [shape: s8[2,8,400], index: 2, kind: input, shape index: {}]   ;;  %s2097_s3 = inlined_call_operand.vmem [shape: s8[2,1,400], index: 3, kind: output, shape index: {0}]   ;;  %s2098_s4 = inlined_call_operand.vmem [shape: f32[2,8,4], index: 4, kind: output, shape index: {1}]   ;;  %s2099_s5 = inlined_call_operand.vmem [shape: s32[2,8,1], index: 5, kind: output, shape index: {2}]  }
   0x1   :  { %2100 = sst [smem:[#allocation3_spill]] %s2094_s0 }
   0x2   :  { %s1528_s18 = smov 0   ;;  %s1530_s19 = smov 0  }
   0x3   :  { %s1532_s20 = smov 0   ;;  %s1534_s21 = smov 0  }
   0x4   :  { %s1536_s22 = smov 0   ;;  %s1538_s23 = smov 0  }
   0x5   :  { %s1540_s24 = smov 0  }
   0x6 LB: > { %s25_s25 = sadd.s32 1, %s1419_s22  ;;  %s28_s26 = sadd.s32 1, %s1423_s23  ;;  %s1427_s24 = sphi %s1540_s24, %s16_s24   ;;  %s1423_s23 = sphi %s1538_s23, %s2124_s23   ;;  %s1419_s22 = sphi %s1536_s22, %s2123_s22   ;;  %s1415_s21 = sphi %s1534_s21, %s2122_s21   ;;  %s1411_s20 = sphi %s1532_s20, %s2121_s20   ;;  %s1407_s19 = sphi %s1530_s19, %s2120_s19   ;;  %s1403_s18 = sphi %s1528_s18, %s2119_s18  }
   0x7   : > { %p26_p0 = scmp.ge.s32.totalorder %s25_s25, 2  ;;  %s1071_s27 = sadd.s32 4294967295, %s1427_s24  }
   0x8   : > { %p127_p1 = scmp.ne.s32.totalorder %s1407_s19, %s1403_s18  ;;  %p128_p2 = scmp.eq.s32.totalorder %s1071_s27, 3 }
   0x9   : > { %s2126_s25 = smov (%p26_p0, %s25_s25), 0  ;;  %s2128_s26 = smov (!%p26_p0, %s28_s26), %s1423_s23 }
   0xa   : > { %s113_s28 = ssub.s32 %s1419_s22, %s2126_s25  ;;  %p30_p3 = scmp.ge.s32.totalorder %s2128_s26, 2 }
   0xb   : > { %p1075_p4 = scmp.ge.s32.totalorder %s1427_s24, 1  ;;  %p1574_p5 = por %p128_p2, %p127_p1 }
   0xc   : > { %p239_p6 = scmp.lt.s32.totalorder %s1427_s24, 5  ;;  %s2130_s26 = smov (%p30_p3, %s2128_s26), 0 }
   0xd   : > { %s112_s30 = ssub.s32 %s1423_s23, %s2130_s26  ;;  %s117_s7 = sadd.s32 1, %s1407_s19 }
   0xe   : > { %p240_p7 = pnand %p1075_p4, %p239_p6  ;;  %s114_s6 = sor.u32 %s113_s28, %s112_s30 }
   0xf   : > { %p115_p8 = scmp.eq.s32.totalorder %s114_s6, 0  ;;  %p290_p9 = scmp.lt.s32.totalorder (!%p240_p7), %s1415_s21, 1  ;;  %v1493_v0 = vmov (!%p240_p7), 0   ;;  %vm354_vm8 = vcmask (!%p240_p7), 1040384   ;;  %vm355_vm9 = vsmask.f32 (!%p240_p7), 0 }
  0x10   : > { %243 = sbr.rel (%p240_p7) target bundleno = 354 (0x162), region = 32  ;;  %1308 = vset.pattern.permute.xlu0 (!%p240_p7), %v1493_v0  ;;  %s2102_s0 = sld [smem:[#allocation3_spill]] (!%p240_p7)  ;;  %vm1621_vm13 = vmand (!%p240_p7), %vm354_vm8, %vm355_vm9 }
  0x11   : > { %s1585_s8 = scalar_select %p115_p8, %s1407_s19, %s117_s7  }
  0x12   : > { %s1613_s11 = smul.u32 (!%p240_p7), 3, %s1411_s20  ;;  %p1082_p11 = scmp.ne.s32.totalorder (!%p240_p7), %s1411_s20, 0 }
  0x14   : > { %p305_p10 = scmp.lt.s32.totalorder (!%p240_p7), %s1613_s11, 3 }
  0x17   : > { %s291_s9 = scalar_select %p290_p9, %s1415_s21, 1 }
  0x18   : > { %s306_s12 = scalar_select %p305_p10, %s1613_s11, 3 }
  0x19   : > { %s1590_s10 = sshll.u32 %s291_s9, 3  ;;  %s1078_s14 = sshll.u32 %s291_s9, 2  ;;  %v1495_v42 = vmov (!%p1082_p11), 0   ;;  %vm413_vm9 = vcmask (!%p1082_p11), 15360  }
  0x1a   : > { %s1596_s13 = scalar_lea.vmem %s2102_s0, %s1590_s10  ;;  %s328_s7 = scalar_lea.vmem %s2099_s5, %s1590_s10 }
  0x1b   : > { %v331_v1 = vld [vmem:[%s1596_s13] sm:$0xff]  ;;  %s308_s15 = sadd.s32 %s1078_s14, %s306_s12  ;;  %s275_s9 = sand.u32 1, %s1403_s18  }
  0x1c   : > { %vm332_vm0 = vcmp.gt.f32.partialorder %v331_v1, 0.7  ;;  %s1079_s16 = sshll.u32 %s308_s15, 1  ;;  %v402_v40 = vld [vmem:[%s1596_s13] sm:$0xff] (!%p1082_p11)  ;;  %s2105_s6 = scalar_lea.vmem (!%p1082_p11), %s2095_s1, %s1590_s10 }
  0x1d   : > { %v335_v2 = vsel %vm332_vm0, 1, %v1493_v0  ;;  %s310_s28 = scalar_lea.vmem %s2096_s2, %s1079_s16  ;;  %s1118_s16 = smul.u32 3, %s275_s9  ;;  %v407_v41 = vld [vmem:[%s2105_s6] sm:$0xff] (!%p1082_p11)  ;;  %vm403_vm8 = vcmp.gt.f32.partialorder (!%p1082_p11), %v402_v40, 0.7 }
  0x1e   : > { %337 = vperm.xlu0 %1308, %v335_v2   ;;  %v333_v3 = vld [vmem:[%s310_s28] sm:$0x3]  ;;  %v1117_v4 = vld [vmem:[%s310_s28 + $0x2] sm:$0xf]   ;;  %s1494_s12 = smov (!%p1082_p11), 2   ;;  %v404_v43 = vsel (!%p1082_p11), %vm403_vm8, 1, %v1495_v42  ;;  %s2106_s17 = scalar_lea.vmem (!%p1082_p11), %s2098_s4, %s1590_s10 }
  0x1f   : > { %v334_v5 = vunpack.c.0.s8 %v333_v3  ;;  %v1115_v6 = vunpack.c.0.s8 %v1117_v4  ;;  %v1116_v7 = vunpack.c.1.s8 %v1117_v4  ;;  %s1625_s18 = scalar_lea.vmem [#allocation2], %s1118_s16  }
  0x20   : > { %v357_v31 = vld [vmem:[%s1625_s18] sm:$0x1]  ;;  %v376_v33 = vld [vmem:[%s1625_s18 + $0x1] sm:$0x1]  ;;  %v395_v36 = vld [vmem:[%s1625_s18 + $0x2] sm:$0x1] }
  0x22   : > { %409 = vrot.lane.b32.xlu0 (!%p1082_p11), %v407_v41, %s1494_s12 }
  0x9d   : > { %v338_v8 = vpop.permute.xlu0 %337 }
  0x9e   : > { %vm339_vm1 = vcmp.eq.s32.totalorder %v338_v8, 1 }
  0x9f   : > { %v340_v9 = vsel %vm339_vm1, %v334_v5, 0  ;;  %v362_v10 = vsel %vm339_vm1, %v1115_v6, 0  ;;  %v381_v11 = vsel %vm339_vm1, %v1116_v7, 0 }
  0xa0   : > { %v341_v12 = vrot.slane %v340_v9, 4  ;;  %v363_v13 = vrot.slane %v362_v10, 4  ;;  %v382_v14 = vrot.slane %v381_v11, 4 }
  0xa1   : > { %v410_v44 = vpop.permute.xlu0 (!%p1082_p11), %409 }
  0xa2   : > { %vm342_vm2 = vcmp.gt.s32.totalorder %v340_v9, %v341_v12  ;;  %vm364_vm3 = vcmp.gt.s32.totalorder %v362_v10, %v363_v13  ;;  %vm383_vm4 = vcmp.gt.s32.totalorder %v381_v11, %v382_v14  ;;  %v412_v45 = vsub.f32 (!%p1082_p11), %v407_v41, %v410_v44 }
  0xa3   : > { %v343_v15 = vsel %vm342_vm2, %v340_v9, %v341_v12  ;;  %v365_v16 = vsel %vm364_vm3, %v362_v10, %v363_v13  ;;  %v384_v17 = vsel %vm383_vm4, %v381_v11, %v382_v14 }
  0xa4   : > { %v344_v18 = vrot.slane %v343_v15, 2  ;;  %v366_v19 = vrot.slane %v365_v16, 2  ;;  %v385_v20 = vrot.slane %v384_v17, 2  ;;  %v414_v46 = vsel (!%p1082_p11), %vm413_vm9, %v407_v41, %v412_v45 }
  0xa6   : > { %vm345_vm5 = vcmp.gt.s32.totalorder %v343_v15, %v344_v18  ;;  %vm367_vm6 = vcmp.gt.s32.totalorder %v365_v16, %v366_v19  ;;  %vm386_vm7 = vcmp.gt.s32.totalorder %v384_v17, %v385_v20 }
  0xa7   : > { %v346_v21 = vsel %vm345_vm5, %v343_v15, %v344_v18  ;;  %v368_v22 = vsel %vm367_vm6, %v365_v16, %v366_v19  ;;  %v387_v23 = vsel %vm386_vm7, %v384_v17, %v385_v20  ;;  %vm405_vm7 = vcmask (!%p1082_p11), 7168  }
  0xa8   : > { %v347_v24 = vrot.slane %v346_v21, 1  ;;  %v369_v25 = vrot.slane %v368_v22, 1  ;;  %v388_v26 = vrot.slane %v387_v23, 1  ;;  %406 = vst.msk [vmem:[%s328_s7] sm:$0xff] (!%p1082_p11), %vm405_vm7, %v404_v43 }
  0xaa   : > { %vm348_vm10 = vcmp.gt.s32.totalorder %v346_v21, %v347_v24  ;;  %vm370_vm11 = vcmp.gt.s32.totalorder %v368_v22, %v369_v25  ;;  %vm389_vm12 = vcmp.gt.s32.totalorder %v387_v23, %v388_v26 }
  0xab   : > { %v349_v27 = vsel %vm348_vm10, %v346_v21, %v347_v24  ;;  %v371_v28 = vsel %vm370_vm11, %v368_v22, %v369_v25  ;;  %v390_v29 = vsel %vm389_vm12, %v387_v23, %v388_v26  ;;  %vm415_vm10 = vcmask (!%p1082_p11), 31744  }
  0xac   : > { %vm350_vm14 = vcmp.gt.s32.totalorder %v349_v27, 0  ;;  %vm372_vm15 = vcmp.gt.s32.totalorder %v371_v28, 0  ;;  %vm391_vm2 = vcmp.gt.s32.totalorder %v390_v29, 0  ;;  %416 = vst.msk [vmem:[%s2106_s17] sm:$0xff] (!%p1082_p11), %vm415_vm10, %v414_v46 }
  0xad   : > { %vm351_vm0 = vmpackc.low %vm350_vm14, %vm350_vm14 }
  0xae   : > { %vm352_vm1 = vmpackc.even %vm351_vm0, %vm351_vm0 }
  0xaf   : > { %v353_v32 = vsel %vm352_vm1, 16843009, %v1493_v0  ;;  %vm373_vm3 = vmpackc.low %vm372_vm15, %vm372_vm15  ;;  %401 = sbr.rel (%p1082_p11) target bundleno = 182 (0xb6), region = 36 }
  0xb0   : > { %v358_v34 = vsel %vm1621_vm13, %v353_v32, %v357_v31  ;;  %vm374_vm4 = vmpackc.even %vm373_vm3, %vm373_vm3 }
  0xb1   : > { %359 = vst [vmem:[%s1625_s18] sm:$0x1] %v358_v34  ;;  %v375_v35 = vsel %vm374_vm4, 16843009, %v1493_v0  ;;  %vm392_vm5 = vmpackc.low %vm391_vm2, %vm391_vm2 }
  0xb2   : > { %v377_v37 = vsel %vm1621_vm13, %v375_v35, %v376_v33  ;;  %vm393_vm6 = vmpackc.even %vm392_vm5, %vm392_vm5 }
  0xb3   : > { %378 = vst [vmem:[%s1625_s18 + $0x1] sm:$0x1] %v377_v37  ;;  %v394_v38 = vsel %vm393_vm6, 16843009, %v1493_v0 }
  0xb4   : > { %v396_v39 = vsel %vm1621_vm13, %v394_v38, %v395_v36 }
  0xb5   : > { %397 = vst [vmem:[%s1625_s18 + $0x2] sm:$0x1] %v396_v39 }
  0xb6 PF: > { %431 = sbr.rel (!%p1574_p5) target bundleno = 354 (0x162), region = 40  ;;  %s433_s27 = ssub.s32 (%p1574_p5), 4, %s1613_s11 }
  0xb7   : > { %s1085_s9 = sshll.u32 (%p1574_p5), %s1415_s21, 2  ;;  %p434_p12 = scmp.lt.s32.totalorder (%p1574_p5), %s433_s27, 3 }
  0xb8   : > { %s439_s7 = sadd.s32 (%p1574_p5), %s1085_s9, %s1613_s11 }
  0xb9   : > { %s1667_s30 = scalar_lea.vmem (%p1574_p5), %s2097_s3, %s439_s7  }
  0xbd   : > { %s2132_s27 = smov (!%p434_p12, %s433_s27), 3 }
  0xbe   : > { %s1083_s10 = sshll.u32 %s2132_s27, 4 }
  0xbf   : > { %p1086_p13 = scmp.eq.s32.totalorder %s1083_s10, 0 }
  0xc0   : > { %p444_p0 = scmp.lt.u32.totalorder (!%p1086_p13), %s2132_s27, 8 }
  0xc1   : > { %443 = sbr.rel (%p1086_p13) target bundleno = 354 (0x162), region = 44 }
  0xc8   : > { %447 = sbr.rel (%p444_p0) target bundleno = 345 (0x159), region = 48  ;;  %s1674_s29 = sand.u32 (!%p444_p0), 7, %s2132_s27  }
  0xc9   : > { %p463_p1 = scmp.eq.s32.totalorder (!%p444_p0), %s1674_s29, 0  ;;  %p1087_p2 = scmp.ne.s32.totalorder (!%p444_p0), %s1674_s29, 0 }
  0xcf   : > { %466 = sbr.rel (%p1087_p2) target bundleno = 274 (0x112), region = 63  ;;  %s467_s21 = sshrl.u32 (!%p1087_p2), %s2132_s27, 3 }
  0xd0   : > { %s1681_s11 = sshrl.u32 (!%p1087_p2), %s467_s21, 6 }
  0xd1   : > { %p1088_p3 = scmp.le.s32.totalorder (!%p1087_p2), %s1681_s11, 0 }
  0xd6   : > { %958 = sbr.rel (%p1088_p3) target bundleno = 254 (0xfe), region = 174  ;;  %s2107_s6 = smov (!%p1088_p3), %s1667_s30 }
  0xd7   : > { %s2108_s12 = smov (!%p1088_p3), %s1625_s18  ;;  %s1690_s14 = smov (!%p1088_p3), 0  }
  0xd8   : > { %s1692_s15 = smov (!%p1088_p3), 0  }
  0xdd LB: >> { %v480_v47 = vld [vmem:[%s1435_s12] sm:$0xff]  ;;  %v482_v48 = vld [vmem:[%s1435_s12 + $0x8] sm:$0xff]  ;;  %v484_v49 = vld [vmem:[%s1435_s12 + $0x10] sm:$0xff]  ;;  %s608_s20 = sadd.s32 1, %s1439_s14  ;;  %s474_s15 = sadd.s32 1, %s1443_s15   ;;  %s1443_s15 = sphi %s1692_s15, %s474_s15   ;;  %s1439_s14 = sphi %s1690_s14, %s2111_s14   ;;  %s1435_s12 = sphi %s2108_s12, %s2110_s12   ;;  %s1431_s6 = sphi %s2107_s6, %s2109_s6  }
  0xde   : >> { %481 = vst [vmem:[%s1431_s6] sm:$0xff] %v480_v47  ;;  %483 = vst [vmem:[%s1431_s6 + $0x8] sm:$0xff] %v482_v48  ;;  %v486_v50 = vld [vmem:[%s1435_s12 + $0x18] sm:$0xff]  ;;  %v488_v51 = vld [vmem:[%s1435_s12 + $0x20] sm:$0xff]  ;;  %p609_p4 = scmp.ge.s32.totalorder %s608_s20, %s1681_s11  ;;  %p473_p5 = scmp.ge.s32.totalorder %s474_s15, %s1681_s11 }
  0xdf   : >> { %485 = vst [vmem:[%s1431_s6 + $0x10] sm:$0xff] %v484_v49  ;;  %v490_v52 = vld [vmem:[%s1435_s12 + $0x28] sm:$0xff]  ;;  %487 = vst [vmem:[%s1431_s6 + $0x18] sm:$0xff] %v486_v50  ;;  %v492_v53 = vld [vmem:[%s1435_s12 + $0x30] sm:$0xff] }
  0xe0   : >> { %489 = vst [vmem:[%s1431_s6 + $0x20] sm:$0xff] %v488_v51  ;;  %491 = vst [vmem:[%s1431_s6 + $0x28] sm:$0xff] %v490_v52  ;;  %v494_v54 = vld [vmem:[%s1435_s12 + $0x38] sm:$0xff]  ;;  %v496_v55 = vld [vmem:[%s1435_s12 + $0x40] sm:$0xff]  ;;  %s2134_s20 = smov (%p609_p4, %s608_s20), 0 }
  0xe1   : >> { %493 = vst [vmem:[%s1431_s6 + $0x30] sm:$0xff] %v492_v53  ;;  %495 = vst [vmem:[%s1431_s6 + $0x38] sm:$0xff] %v494_v54  ;;  %v498_v56 = vld [vmem:[%s1435_s12 + $0x48] sm:$0xff]  ;;  %v500_v57 = vld [vmem:[%s1435_s12 + $0x50] sm:$0xff]  ;;  %s1089_s13 = sshll.u32 %s2134_s20, 9  ;;  %s2111_s14 = smov %s2134_s20 }
  0xe2   : >> { %497 = vst [vmem:[%s1431_s6 + $0x40] sm:$0xff] %v496_v55  ;;  %v502_v58 = vld [vmem:[%s1435_s12 + $0x58] sm:$0xff]  ;;  %499 = vst [vmem:[%s1431_s6 + $0x48] sm:$0xff] %v498_v56  ;;  %v504_v59 = vld [vmem:[%s1435_s12 + $0x60] sm:$0xff]  ;;  %s1748_s17 = scalar_lea.vmem %s1625_s18, %s1089_s13 [#allocation2]   ;;  %s1751_s9 = scalar_lea.vmem %s1667_s30, %s1089_s13  }
  0xe3   : >> { %501 = vst [vmem:[%s1431_s6 + $0x50] sm:$0xff] %v500_v57  ;;  %503 = vst [vmem:[%s1431_s6 + $0x58] sm:$0xff] %v502_v58  ;;  %v506_v60 = vld [vmem:[%s1435_s12 + $0x68] sm:$0xff]  ;;  %v508_v61 = vld [vmem:[%s1435_s12 + $0x70] sm:$0xff] }
  0xe4   : >> { %505 = vst [vmem:[%s1431_s6 + $0x60] sm:$0xff] %v504_v59  ;;  %507 = vst [vmem:[%s1431_s6 + $0x68] sm:$0xff] %v506_v60  ;;  %v510_v62 = vld [vmem:[%s1435_s12 + $0x78] sm:$0xff]  ;;  %v512_v63 = vld [vmem:[%s1435_s12 + $0x80] sm:$0xff] }
  0xe5   : >> { %509 = vst [vmem:[%s1431_s6 + $0x70] sm:$0xff] %v508_v61  ;;  %v514_v0 = vld [vmem:[%s1435_s12 + $0x88] sm:$0xff]  ;;  %511 = vst [vmem:[%s1431_s6 + $0x78] sm:$0xff] %v510_v62  ;;  %v516_v1 = vld [vmem:[%s1435_s12 + $0x90] sm:$0xff] }
  0xe6   : >> { %513 = vst [vmem:[%s1431_s6 + $0x80] sm:$0xff] %v512_v63  ;;  %515 = vst [vmem:[%s1431_s6 + $0x88] sm:$0xff] %v514_v0  ;;  %v518_v2 = vld [vmem:[%s1435_s12 + $0x98] sm:$0xff]  ;;  %v520_v3 = vld [vmem:[%s1435_s12 + $0xa0] sm:$0xff] }
  0xe7   : >> { %517 = vst [vmem:[%s1431_s6 + $0x90] sm:$0xff] %v516_v1  ;;  %519 = vst [vmem:[%s1431_s6 + $0x98] sm:$0xff] %v518_v2  ;;  %v522_v4 = vld [vmem:[%s1435_s12 + $0xa8] sm:$0xff]  ;;  %v524_v5 = vld [vmem:[%s1435_s12 + $0xb0] sm:$0xff] }
  0xe8   : >> { %521 = vst [vmem:[%s1431_s6 + $0xa0] sm:$0xff] %v520_v3  ;;  %v526_v6 = vld [vmem:[%s1435_s12 + $0xb8] sm:$0xff]  ;;  %523 = vst [vmem:[%s1431_s6 + $0xa8] sm:$0xff] %v522_v4  ;;  %v528_v7 = vld [vmem:[%s1435_s12 + $0xc0] sm:$0xff] }
  0xe9   : >> { %525 = vst [vmem:[%s1431_s6 + $0xb0] sm:$0xff] %v524_v5  ;;  %527 = vst [vmem:[%s1431_s6 + $0xb8] sm:$0xff] %v526_v6  ;;  %v530_v8 = vld [vmem:[%s1435_s12 + $0xc8] sm:$0xff]  ;;  %v532_v9 = vld [vmem:[%s1435_s12 + $0xd0] sm:$0xff] }
  0xea   : >> { %529 = vst [vmem:[%s1431_s6 + $0xc0] sm:$0xff] %v528_v7  ;;  %531 = vst [vmem:[%s1431_s6 + $0xc8] sm:$0xff] %v530_v8  ;;  %v534_v10 = vld [vmem:[%s1435_s12 + $0xd8] sm:$0xff]  ;;  %v536_v11 = vld [vmem:[%s1435_s12 + $0xe0] sm:$0xff] }
  0xeb   : >> { %533 = vst [vmem:[%s1431_s6 + $0xd0] sm:$0xff] %v532_v9  ;;  %v538_v12 = vld [vmem:[%s1435_s12 + $0xe8] sm:$0xff]  ;;  %535 = vst [vmem:[%s1431_s6 + $0xd8] sm:$0xff] %v534_v10  ;;  %v540_v13 = vld [vmem:[%s1435_s12 + $0xf0] sm:$0xff] }
  0xec   : >> { %537 = vst [vmem:[%s1431_s6 + $0xe0] sm:$0xff] %v536_v11  ;;  %539 = vst [vmem:[%s1431_s6 + $0xe8] sm:$0xff] %v538_v12  ;;  %v542_v14 = vld [vmem:[%s1435_s12 + $0xf8] sm:$0xff]  ;;  %v544_v15 = vld [vmem:[%s1435_s12 + $0x100] sm:$0xff] }
  0xed   : >> { %541 = vst [vmem:[%s1431_s6 + $0xf0] sm:$0xff] %v540_v13  ;;  %543 = vst [vmem:[%s1431_s6 + $0xf8] sm:$0xff] %v542_v14  ;;  %v546_v16 = vld [vmem:[%s1435_s12 + $0x108] sm:$0xff]  ;;  %v548_v17 = vld [vmem:[%s1435_s12 + $0x110] sm:$0xff] }
  0xee   : >> { %545 = vst [vmem:[%s1431_s6 + $0x100] sm:$0xff] %v544_v15  ;;  %v550_v18 = vld [vmem:[%s1435_s12 + $0x118] sm:$0xff]  ;;  %547 = vst [vmem:[%s1431_s6 + $0x108] sm:$0xff] %v546_v16  ;;  %v552_v19 = vld [vmem:[%s1435_s12 + $0x120] sm:$0xff] }
  0xef   : >> { %549 = vst [vmem:[%s1431_s6 + $0x110] sm:$0xff] %v548_v17  ;;  %551 = vst [vmem:[%s1431_s6 + $0x118] sm:$0xff] %v550_v18  ;;  %v554_v20 = vld [vmem:[%s1435_s12 + $0x128] sm:$0xff]  ;;  %v556_v21 = vld [vmem:[%s1435_s12 + $0x130] sm:$0xff] }
  0xf0   : >> { %553 = vst [vmem:[%s1431_s6 + $0x120] sm:$0xff] %v552_v19  ;;  %555 = vst [vmem:[%s1431_s6 + $0x128] sm:$0xff] %v554_v20  ;;  %v558_v22 = vld [vmem:[%s1435_s12 + $0x138] sm:$0xff]  ;;  %v560_v23 = vld [vmem:[%s1435_s12 + $0x140] sm:$0xff] }
  0xf1   : >> { %557 = vst [vmem:[%s1431_s6 + $0x130] sm:$0xff] %v556_v21  ;;  %v562_v24 = vld [vmem:[%s1435_s12 + $0x148] sm:$0xff]  ;;  %559 = vst [vmem:[%s1431_s6 + $0x138] sm:$0xff] %v558_v22  ;;  %v564_v25 = vld [vmem:[%s1435_s12 + $0x150] sm:$0xff] }
  0xf2   : >> { %561 = vst [vmem:[%s1431_s6 + $0x140] sm:$0xff] %v560_v23  ;;  %563 = vst [vmem:[%s1431_s6 + $0x148] sm:$0xff] %v562_v24  ;;  %v566_v26 = vld [vmem:[%s1435_s12 + $0x158] sm:$0xff]  ;;  %v568_v27 = vld [vmem:[%s1435_s12 + $0x160] sm:$0xff] }
  0xf3   : >> { %565 = vst [vmem:[%s1431_s6 + $0x150] sm:$0xff] %v564_v25  ;;  %567 = vst [vmem:[%s1431_s6 + $0x158] sm:$0xff] %v566_v26  ;;  %v570_v28 = vld [vmem:[%s1435_s12 + $0x168] sm:$0xff]  ;;  %v572_v29 = vld [vmem:[%s1435_s12 + $0x170] sm:$0xff] }
  0xf4   : >> { %569 = vst [vmem:[%s1431_s6 + $0x160] sm:$0xff] %v568_v27  ;;  %v574_v30 = vld [vmem:[%s1435_s12 + $0x178] sm:$0xff]  ;;  %571 = vst [vmem:[%s1431_s6 + $0x168] sm:$0xff] %v570_v28  ;;  %v576_v31 = vld [vmem:[%s1435_s12 + $0x180] sm:$0xff] }
  0xf5   : >> { %573 = vst [vmem:[%s1431_s6 + $0x170] sm:$0xff] %v572_v29  ;;  %575 = vst [vmem:[%s1431_s6 + $0x178] sm:$0xff] %v574_v30  ;;  %v578_v32 = vld [vmem:[%s1435_s12 + $0x188] sm:$0xff]  ;;  %v580_v33 = vld [vmem:[%s1435_s12 + $0x190] sm:$0xff] }
  0xf6   : >> { %577 = vst [vmem:[%s1431_s6 + $0x180] sm:$0xff] %v576_v31  ;;  %579 = vst [vmem:[%s1431_s6 + $0x188] sm:$0xff] %v578_v32  ;;  %v582_v34 = vld [vmem:[%s1435_s12 + $0x198] sm:$0xff]  ;;  %v584_v35 = vld [vmem:[%s1435_s12 + $0x1a0] sm:$0xff] }
  0xf7   : >> { %581 = vst [vmem:[%s1431_s6 + $0x190] sm:$0xff] %v580_v33  ;;  %v586_v36 = vld [vmem:[%s1435_s12 + $0x1a8] sm:$0xff]  ;;  %583 = vst [vmem:[%s1431_s6 + $0x198] sm:$0xff] %v582_v34  ;;  %v588_v37 = vld [vmem:[%s1435_s12 + $0x1b0] sm:$0xff]  ;;  %476 = sbr.rel (!%p473_p5) target bundleno = 221 (0xdd), region = 180 }
  0xf8   : >> { %585 = vst [vmem:[%s1431_s6 + $0x1a0] sm:$0xff] %v584_v35  ;;  %587 = vst [vmem:[%s1431_s6 + $0x1a8] sm:$0xff] %v586_v36  ;;  %v590_v38 = vld [vmem:[%s1435_s12 + $0x1b8] sm:$0xff]  ;;  %v592_v39 = vld [vmem:[%s1435_s12 + $0x1c0] sm:$0xff] }
  0xf9   : >> { %589 = vst [vmem:[%s1431_s6 + $0x1b0] sm:$0xff] %v588_v37  ;;  %591 = vst [vmem:[%s1431_s6 + $0x1b8] sm:$0xff] %v590_v38  ;;  %v594_v40 = vld [vmem:[%s1435_s12 + $0x1c8] sm:$0xff]  ;;  %v596_v41 = vld [vmem:[%s1435_s12 + $0x1d0] sm:$0xff] }
  0xfa   : >> { %593 = vst [vmem:[%s1431_s6 + $0x1c0] sm:$0xff] %v592_v39  ;;  %v598_v42 = vld [vmem:[%s1435_s12 + $0x1d8] sm:$0xff]  ;;  %595 = vst [vmem:[%s1431_s6 + $0x1c8] sm:$0xff] %v594_v40  ;;  %v600_v43 = vld [vmem:[%s1435_s12 + $0x1e0] sm:$0xff] }
  0xfb   : >> { %597 = vst [vmem:[%s1431_s6 + $0x1d0] sm:$0xff] %v596_v41  ;;  %599 = vst [vmem:[%s1431_s6 + $0x1d8] sm:$0xff] %v598_v42  ;;  %v602_v44 = vld [vmem:[%s1435_s12 + $0x1e8] sm:$0xff]  ;;  %v604_v45 = vld [vmem:[%s1435_s12 + $0x1f0] sm:$0xff] }
  0xfc   : >> { %601 = vst [vmem:[%s1431_s6 + $0x1e0] sm:$0xff] %v600_v43  ;;  %603 = vst [vmem:[%s1431_s6 + $0x1e8] sm:$0xff] %v602_v44  ;;  %v606_v46 = vld [vmem:[%s1435_s12 + $0x1f8] sm:$0xff]  ;;  %s2110_s12 = smov %s1748_s17 }
  0xfd   : >> { %605 = vst [vmem:[%s1431_s6 + $0x1f0] sm:$0xff] %v604_v45  ;;  %607 = vst [vmem:[%s1431_s6 + $0x1f8] sm:$0xff] %v606_v46  ;;  %s2109_s6 = smov %s1751_s9 }
  0xfe PF: > { %s1857_s7 = sand.u32 63, %s467_s21   ;;  %s1109_s16 = sshll.u32 %s1681_s11, 13 }
  0xff   : > { %s619_s28 = sshra.s32 %s1109_s16, 4  ;;  %p1094_p6 = scmp.le.s32.totalorder %s1857_s7, 0 }
 0x100   : > { %s620_s10 = scalar_lea.vmem %s1625_s18, %s619_s28 [#allocation2]   ;;  %s623_s13 = scalar_lea.vmem %s1667_s30, %s619_s28  }
 0x101   : > { %972 = sbr.rel (%p1094_p6) target bundleno = 274 (0x112), region = 185  ;;  %s1445_s17 = smov (!%p1094_p6), %s623_s13  }
 0x102   : > { %s1449_s20 = smov (!%p1094_p6), %s620_s10   ;;  %s1453_s9 = smov (!%p1094_p6), 0  }
 0x103   : > { %s1457_s15 = smov (!%p1094_p6), 0  }
 0x108 LB: >> { %v635_v47 = vld [vmem:[%s1451_s20] sm:$0xff]  ;;  %s637_s21 = sadd.s32 1, %s1455_s9  ;;  %s629_s15 = sadd.s32 1, %s1459_s15   ;;  %s1459_s15 = sphi %s1457_s15, %s629_s15   ;;  %s1455_s9 = sphi %s1453_s9, %s1454_s9   ;;  %s1451_s20 = sphi %s1449_s20, %s642_s20   ;;  %s1447_s17 = sphi %s1445_s17, %s643_s17  }
 0x109   : >> { %636 = vst [vmem:[%s1447_s17] sm:$0xff] %v635_v47  ;;  %p638_p7 = scmp.ge.s32.totalorder %s637_s21, %s1857_s7  ;;  %p628_p8 = scmp.ge.s32.totalorder %s629_s15, %s1857_s7 }
 0x10b   : >> { %s2136_s21 = smov (%p638_p7, %s637_s21), 0  ;;  %631 = sbr.rel (!%p628_p8) target bundleno = 264 (0x108), region = 191 }
 0x10c   : >> { %s1095_s11 = sshll.u32 %s2136_s21, 3  ;;  %s1454_s9 = smov %s2136_s21  }
 0x10d   : >> { %s642_s20 = scalar_lea.vmem %s620_s10, %s1095_s11 [#allocation2]   ;;  %s643_s17 = scalar_lea.vmem %s623_s13, %s1095_s11  }
 0x112 PF: > { %646 = sbr.rel (%p463_p1) target bundleno = 345 (0x159), region = 81  ;;  %s1869_s6 = ssub.s32 (!%p463_p1), %s2132_s27, %s1674_s29 }
 0x113   : > { %s652_s12 = sshrl.u32 (!%p463_p1), %s2132_s27, 3 }
 0x114   : > { %s1878_s28 = sshrl.u32 (!%p463_p1), %s652_s12, 6 }
 0x115   : > { %p1097_p9 = scmp.le.s32.totalorder (!%p463_p1), %s1878_s28, 0 }
 0x119   : > { %986 = sbr.rel (%p1097_p9) target bundleno = 321 (0x141), region = 196  ;;  %s2112_s7 = smov (!%p1097_p9), %s1667_s30 }
 0x11a   : > { %s2113_s10 = smov (!%p1097_p9), %s1625_s18  ;;  %s1887_s13 = smov (!%p1097_p9), 0  }
 0x11b   : > { %s1889_s17 = smov (!%p1097_p9), 0  }
 0x120 LB: >> { %v665_v48 = vld [vmem:[%s1467_s10] sm:$0xff]  ;;  %v667_v49 = vld [vmem:[%s1467_s10 + $0x8] sm:$0xff]  ;;  %v669_v50 = vld [vmem:[%s1467_s10 + $0x10] sm:$0xff]  ;;  %s793_s20 = sadd.s32 1, %s1471_s13  ;;  %s659_s17 = sadd.s32 1, %s1475_s17   ;;  %s1475_s17 = sphi %s1889_s17, %s659_s17   ;;  %s1471_s13 = sphi %s1887_s13, %s2116_s13   ;;  %s1467_s10 = sphi %s2113_s10, %s2115_s10   ;;  %s1463_s7 = sphi %s2112_s7, %s2114_s7  }
 0x121   : >> { %666 = vst [vmem:[%s1463_s7] sm:$0xff] %v665_v48  ;;  %668 = vst [vmem:[%s1463_s7 + $0x8] sm:$0xff] %v667_v49  ;;  %v671_v51 = vld [vmem:[%s1467_s10 + $0x18] sm:$0xff]  ;;  %v673_v52 = vld [vmem:[%s1467_s10 + $0x20] sm:$0xff]  ;;  %p794_p10 = scmp.ge.s32.totalorder %s793_s20, %s1878_s28  ;;  %p658_p11 = scmp.ge.s32.totalorder %s659_s17, %s1878_s28 }
 0x122   : >> { %670 = vst [vmem:[%s1463_s7 + $0x10] sm:$0xff] %v669_v50  ;;  %v675_v53 = vld [vmem:[%s1467_s10 + $0x28] sm:$0xff]  ;;  %672 = vst [vmem:[%s1463_s7 + $0x18] sm:$0xff] %v671_v51  ;;  %v677_v54 = vld [vmem:[%s1467_s10 + $0x30] sm:$0xff] }
 0x123   : >> { %674 = vst [vmem:[%s1463_s7 + $0x20] sm:$0xff] %v673_v52  ;;  %676 = vst [vmem:[%s1463_s7 + $0x28] sm:$0xff] %v675_v53  ;;  %v679_v55 = vld [vmem:[%s1467_s10 + $0x38] sm:$0xff]  ;;  %v681_v56 = vld [vmem:[%s1467_s10 + $0x40] sm:$0xff]  ;;  %s2138_s20 = smov (%p794_p10, %s793_s20), 0 }
 0x124   : >> { %678 = vst [vmem:[%s1463_s7 + $0x30] sm:$0xff] %v677_v54  ;;  %680 = vst [vmem:[%s1463_s7 + $0x38] sm:$0xff] %v679_v55  ;;  %v683_v57 = vld [vmem:[%s1467_s10 + $0x48] sm:$0xff]  ;;  %v685_v58 = vld [vmem:[%s1467_s10 + $0x50] sm:$0xff]  ;;  %s1098_s9 = sshll.u32 %s2138_s20, 9  ;;  %s2116_s13 = smov %s2138_s20 }
 0x125   : >> { %682 = vst [vmem:[%s1463_s7 + $0x40] sm:$0xff] %v681_v56  ;;  %v687_v59 = vld [vmem:[%s1467_s10 + $0x58] sm:$0xff]  ;;  %684 = vst [vmem:[%s1463_s7 + $0x48] sm:$0xff] %v683_v57  ;;  %v689_v60 = vld [vmem:[%s1467_s10 + $0x60] sm:$0xff]  ;;  %s1945_s15 = scalar_lea.vmem %s1625_s18, %s1098_s9 [#allocation2]   ;;  %s1948_s21 = scalar_lea.vmem %s1667_s30, %s1098_s9  }
 0x126   : >> { %686 = vst [vmem:[%s1463_s7 + $0x50] sm:$0xff] %v685_v58  ;;  %688 = vst [vmem:[%s1463_s7 + $0x58] sm:$0xff] %v687_v59  ;;  %v691_v61 = vld [vmem:[%s1467_s10 + $0x68] sm:$0xff]  ;;  %v693_v62 = vld [vmem:[%s1467_s10 + $0x70] sm:$0xff] }
 0x127   : >> { %690 = vst [vmem:[%s1463_s7 + $0x60] sm:$0xff] %v689_v60  ;;  %692 = vst [vmem:[%s1463_s7 + $0x68] sm:$0xff] %v691_v61  ;;  %v695_v63 = vld [vmem:[%s1467_s10 + $0x78] sm:$0xff]  ;;  %v697_v0 = vld [vmem:[%s1467_s10 + $0x80] sm:$0xff] }
 0x128   : >> { %694 = vst [vmem:[%s1463_s7 + $0x70] sm:$0xff] %v693_v62  ;;  %v699_v1 = vld [vmem:[%s1467_s10 + $0x88] sm:$0xff]  ;;  %696 = vst [vmem:[%s1463_s7 + $0x78] sm:$0xff] %v695_v63  ;;  %v701_v2 = vld [vmem:[%s1467_s10 + $0x90] sm:$0xff] }
 0x129   : >> { %698 = vst [vmem:[%s1463_s7 + $0x80] sm:$0xff] %v697_v0  ;;  %700 = vst [vmem:[%s1463_s7 + $0x88] sm:$0xff] %v699_v1  ;;  %v703_v3 = vld [vmem:[%s1467_s10 + $0x98] sm:$0xff]  ;;  %v705_v4 = vld [vmem:[%s1467_s10 + $0xa0] sm:$0xff] }
 0x12a   : >> { %702 = vst [vmem:[%s1463_s7 + $0x90] sm:$0xff] %v701_v2  ;;  %704 = vst [vmem:[%s1463_s7 + $0x98] sm:$0xff] %v703_v3  ;;  %v707_v5 = vld [vmem:[%s1467_s10 + $0xa8] sm:$0xff]  ;;  %v709_v6 = vld [vmem:[%s1467_s10 + $0xb0] sm:$0xff] }
 0x12b   : >> { %706 = vst [vmem:[%s1463_s7 + $0xa0] sm:$0xff] %v705_v4  ;;  %v711_v7 = vld [vmem:[%s1467_s10 + $0xb8] sm:$0xff]  ;;  %708 = vst [vmem:[%s1463_s7 + $0xa8] sm:$0xff] %v707_v5  ;;  %v713_v8 = vld [vmem:[%s1467_s10 + $0xc0] sm:$0xff] }
 0x12c   : >> { %710 = vst [vmem:[%s1463_s7 + $0xb0] sm:$0xff] %v709_v6  ;;  %712 = vst [vmem:[%s1463_s7 + $0xb8] sm:$0xff] %v711_v7  ;;  %v715_v9 = vld [vmem:[%s1467_s10 + $0xc8] sm:$0xff]  ;;  %v717_v10 = vld [vmem:[%s1467_s10 + $0xd0] sm:$0xff] }
 0x12d   : >> { %714 = vst [vmem:[%s1463_s7 + $0xc0] sm:$0xff] %v713_v8  ;;  %716 = vst [vmem:[%s1463_s7 + $0xc8] sm:$0xff] %v715_v9  ;;  %v719_v11 = vld [vmem:[%s1467_s10 + $0xd8] sm:$0xff]  ;;  %v721_v12 = vld [vmem:[%s1467_s10 + $0xe0] sm:$0xff] }
 0x12e   : >> { %718 = vst [vmem:[%s1463_s7 + $0xd0] sm:$0xff] %v717_v10  ;;  %v723_v13 = vld [vmem:[%s1467_s10 + $0xe8] sm:$0xff]  ;;  %720 = vst [vmem:[%s1463_s7 + $0xd8] sm:$0xff] %v719_v11  ;;  %v725_v14 = vld [vmem:[%s1467_s10 + $0xf0] sm:$0xff] }
 0x12f   : >> { %722 = vst [vmem:[%s1463_s7 + $0xe0] sm:$0xff] %v721_v12  ;;  %724 = vst [vmem:[%s1463_s7 + $0xe8] sm:$0xff] %v723_v13  ;;  %v727_v15 = vld [vmem:[%s1467_s10 + $0xf8] sm:$0xff]  ;;  %v729_v16 = vld [vmem:[%s1467_s10 + $0x100] sm:$0xff] }
 0x130   : >> { %726 = vst [vmem:[%s1463_s7 + $0xf0] sm:$0xff] %v725_v14  ;;  %728 = vst [vmem:[%s1463_s7 + $0xf8] sm:$0xff] %v727_v15  ;;  %v731_v17 = vld [vmem:[%s1467_s10 + $0x108] sm:$0xff]  ;;  %v733_v18 = vld [vmem:[%s1467_s10 + $0x110] sm:$0xff] }
 0x131   : >> { %730 = vst [vmem:[%s1463_s7 + $0x100] sm:$0xff] %v729_v16  ;;  %v735_v19 = vld [vmem:[%s1467_s10 + $0x118] sm:$0xff]  ;;  %732 = vst [vmem:[%s1463_s7 + $0x108] sm:$0xff] %v731_v17  ;;  %v737_v20 = vld [vmem:[%s1467_s10 + $0x120] sm:$0xff] }
 0x132   : >> { %734 = vst [vmem:[%s1463_s7 + $0x110] sm:$0xff] %v733_v18  ;;  %736 = vst [vmem:[%s1463_s7 + $0x118] sm:$0xff] %v735_v19  ;;  %v739_v21 = vld [vmem:[%s1467_s10 + $0x128] sm:$0xff]  ;;  %v741_v22 = vld [vmem:[%s1467_s10 + $0x130] sm:$0xff] }
 0x133   : >> { %738 = vst [vmem:[%s1463_s7 + $0x120] sm:$0xff] %v737_v20  ;;  %740 = vst [vmem:[%s1463_s7 + $0x128] sm:$0xff] %v739_v21  ;;  %v743_v23 = vld [vmem:[%s1467_s10 + $0x138] sm:$0xff]  ;;  %v745_v24 = vld [vmem:[%s1467_s10 + $0x140] sm:$0xff] }
 0x134   : >> { %742 = vst [vmem:[%s1463_s7 + $0x130] sm:$0xff] %v741_v22  ;;  %v747_v25 = vld [vmem:[%s1467_s10 + $0x148] sm:$0xff]  ;;  %744 = vst [vmem:[%s1463_s7 + $0x138] sm:$0xff] %v743_v23  ;;  %v749_v26 = vld [vmem:[%s1467_s10 + $0x150] sm:$0xff] }
 0x135   : >> { %746 = vst [vmem:[%s1463_s7 + $0x140] sm:$0xff] %v745_v24  ;;  %748 = vst [vmem:[%s1463_s7 + $0x148] sm:$0xff] %v747_v25  ;;  %v751_v27 = vld [vmem:[%s1467_s10 + $0x158] sm:$0xff]  ;;  %v753_v28 = vld [vmem:[%s1467_s10 + $0x160] sm:$0xff] }
 0x136   : >> { %750 = vst [vmem:[%s1463_s7 + $0x150] sm:$0xff] %v749_v26  ;;  %752 = vst [vmem:[%s1463_s7 + $0x158] sm:$0xff] %v751_v27  ;;  %v755_v29 = vld [vmem:[%s1467_s10 + $0x168] sm:$0xff]  ;;  %v757_v30 = vld [vmem:[%s1467_s10 + $0x170] sm:$0xff] }
 0x137   : >> { %754 = vst [vmem:[%s1463_s7 + $0x160] sm:$0xff] %v753_v28  ;;  %v759_v31 = vld [vmem:[%s1467_s10 + $0x178] sm:$0xff]  ;;  %756 = vst [vmem:[%s1463_s7 + $0x168] sm:$0xff] %v755_v29  ;;  %v761_v32 = vld [vmem:[%s1467_s10 + $0x180] sm:$0xff] }
 0x138   : >> { %758 = vst [vmem:[%s1463_s7 + $0x170] sm:$0xff] %v757_v30  ;;  %760 = vst [vmem:[%s1463_s7 + $0x178] sm:$0xff] %v759_v31  ;;  %v763_v33 = vld [vmem:[%s1467_s10 + $0x188] sm:$0xff]  ;;  %v765_v34 = vld [vmem:[%s1467_s10 + $0x190] sm:$0xff] }
 0x139   : >> { %762 = vst [vmem:[%s1463_s7 + $0x180] sm:$0xff] %v761_v32  ;;  %764 = vst [vmem:[%s1463_s7 + $0x188] sm:$0xff] %v763_v33  ;;  %v767_v35 = vld [vmem:[%s1467_s10 + $0x198] sm:$0xff]  ;;  %v769_v36 = vld [vmem:[%s1467_s10 + $0x1a0] sm:$0xff] }
 0x13a   : >> { %766 = vst [vmem:[%s1463_s7 + $0x190] sm:$0xff] %v765_v34  ;;  %v771_v37 = vld [vmem:[%s1467_s10 + $0x1a8] sm:$0xff]  ;;  %768 = vst [vmem:[%s1463_s7 + $0x198] sm:$0xff] %v767_v35  ;;  %v773_v38 = vld [vmem:[%s1467_s10 + $0x1b0] sm:$0xff]  ;;  %661 = sbr.rel (!%p658_p11) target bundleno = 288 (0x120), region = 202 }
 0x13b   : >> { %770 = vst [vmem:[%s1463_s7 + $0x1a0] sm:$0xff] %v769_v36  ;;  %772 = vst [vmem:[%s1463_s7 + $0x1a8] sm:$0xff] %v771_v37  ;;  %v775_v39 = vld [vmem:[%s1467_s10 + $0x1b8] sm:$0xff]  ;;  %v777_v40 = vld [vmem:[%s1467_s10 + $0x1c0] sm:$0xff] }
 0x13c   : >> { %774 = vst [vmem:[%s1463_s7 + $0x1b0] sm:$0xff] %v773_v38  ;;  %776 = vst [vmem:[%s1463_s7 + $0x1b8] sm:$0xff] %v775_v39  ;;  %v779_v41 = vld [vmem:[%s1467_s10 + $0x1c8] sm:$0xff]  ;;  %v781_v42 = vld [vmem:[%s1467_s10 + $0x1d0] sm:$0xff] }
 0x13d   : >> { %778 = vst [vmem:[%s1463_s7 + $0x1c0] sm:$0xff] %v777_v40  ;;  %v783_v43 = vld [vmem:[%s1467_s10 + $0x1d8] sm:$0xff]  ;;  %780 = vst [vmem:[%s1463_s7 + $0x1c8] sm:$0xff] %v779_v41  ;;  %v785_v44 = vld [vmem:[%s1467_s10 + $0x1e0] sm:$0xff] }
 0x13e   : >> { %782 = vst [vmem:[%s1463_s7 + $0x1d0] sm:$0xff] %v781_v42  ;;  %784 = vst [vmem:[%s1463_s7 + $0x1d8] sm:$0xff] %v783_v43  ;;  %v787_v45 = vld [vmem:[%s1467_s10 + $0x1e8] sm:$0xff]  ;;  %v789_v46 = vld [vmem:[%s1467_s10 + $0x1f0] sm:$0xff] }
 0x13f   : >> { %786 = vst [vmem:[%s1463_s7 + $0x1e0] sm:$0xff] %v785_v44  ;;  %788 = vst [vmem:[%s1463_s7 + $0x1e8] sm:$0xff] %v787_v45  ;;  %v791_v47 = vld [vmem:[%s1467_s10 + $0x1f8] sm:$0xff]  ;;  %s2115_s10 = smov %s1945_s15 }
 0x140   : >> { %790 = vst [vmem:[%s1463_s7 + $0x1f0] sm:$0xff] %v789_v46  ;;  %792 = vst [vmem:[%s1463_s7 + $0x1f8] sm:$0xff] %v791_v47  ;;  %s2114_s7 = smov %s1948_s21 }
 0x141 PF: > { %s2054_s11 = sand.u32 63, %s652_s12   ;;  %s1111_s9 = sshll.u32 %s1878_s28, 13 }
 0x142   : > { %s804_s16 = sshra.s32 %s1111_s9, 4  ;;  %p1103_p12 = scmp.le.s32.totalorder %s2054_s11, 0 }
 0x143   : > { %s805_s14 = scalar_lea.vmem %s1625_s18, %s804_s16 [#allocation2]   ;;  %s808_s0 = scalar_lea.vmem %s1667_s30, %s804_s16  }
 0x144   : > { %1000 = sbr.rel (%p1103_p12) target bundleno = 341 (0x155), region = 207  ;;  %s1477_s15 = smov (!%p1103_p12), %s808_s0  }
 0x145   : > { %s1481_s20 = smov (!%p1103_p12), %s805_s14   ;;  %s1485_s21 = smov (!%p1103_p12), 0  }
 0x146   : > { %s1489_s17 = smov (!%p1103_p12), 0  }
 0x14b LB: >> { %v820_v48 = vld [vmem:[%s1483_s20] sm:$0xff]  ;;  %s822_s12 = sadd.s32 1, %s1487_s21  ;;  %s814_s17 = sadd.s32 1, %s1491_s17   ;;  %s1491_s17 = sphi %s1489_s17, %s814_s17   ;;  %s1487_s21 = sphi %s1485_s21, %s1486_s21   ;;  %s1483_s20 = sphi %s1481_s20, %s827_s20   ;;  %s1479_s15 = sphi %s1477_s15, %s828_s15  }
 0x14c   : >> { %821 = vst [vmem:[%s1479_s15] sm:$0xff] %v820_v48  ;;  %p823_p13 = scmp.ge.s32.totalorder %s822_s12, %s2054_s11  ;;  %p813_p0 = scmp.ge.s32.totalorder %s814_s17, %s2054_s11 }
 0x14e   : >> { %s2140_s12 = smov (%p823_p13, %s822_s12), 0  ;;  %816 = sbr.rel (!%p813_p0) target bundleno = 331 (0x14b), region = 213 }
 0x14f   : >> { %s1104_s16 = sshll.u32 %s2140_s12, 3  ;;  %s1486_s21 = smov %s2140_s12  }
 0x150   : >> { %s827_s20 = scalar_lea.vmem %s805_s14, %s1104_s16 [#allocation2]   ;;  %s828_s15 = scalar_lea.vmem %s808_s0, %s1104_s16  }
 0x155 PF: > { %s1496_s28 = smov 0   ;;  %s2117_s10 = scalar_lea.vmem %s1625_s18, %s1869_s6 [#allocation2] }
 0x156   : > { %s829_s7 = sshllo.u32 %s1496_s28, %s1674_s29  ;;  %s2118_s13 = scalar_lea.vmem %s1667_s30, %s1869_s6 }
 0x157   : > { %v838_v49 = vld [vmem:[%s2117_s10] sm:%s829_s7] }
 0x158   : > { %839 = vst [vmem:[%s2118_s13] sm:%s829_s7] %v838_v49 }
 0x159 PF: > { %p1106_p1 = scmp.ge.u32.totalorder %s2132_s27, 8 }
 0x15a   : > { %s1497_s9 = smov (!%p1106_p1), 0  }
 0x15b   : > { %450 = sbr.rel (%p1106_p1) target bundleno = 354 (0x162), region = 52  ;;  %s451_s0 = sshllo.u32 (!%p1106_p1), %s1497_s9, %s2132_s27 }
 0x15c   : > { %v460_v50 = vld [vmem:[%s1625_s18] sm:%s451_s0] (!%p1106_p1) }
 0x15d   : > { %461 = vst [vmem:[%s1667_s30] sm:%s451_s0] (!%p1106_p1), %v460_v50 }
 0x162 PF: > { %s16_s24 = sadd.s32 1, %s1427_s24   ;;  %s2119_s18 = smov %s1407_s19 }
 0x163   : > { %p13_p2 = scmp.ge.s32.totalorder %s16_s24, 6   ;;  %s2120_s19 = smov %s1585_s8 }
 0x164   : > { %s2121_s20 = smov %s1419_s22  ;;  %s2122_s21 = smov %s1423_s23 }
 0x165   : > { %s2123_s22 = smov %s2126_s25  ;;  %s2124_s23 = smov %s2130_s26 }
 0x166   :  { %15 = sbr.rel (!%p13_p2) target bundleno = 6 (0x6), region = 224 }

</bundles_post_ra>
